<compile_context>
chip_gen: v6e
topology: v6e:2x2x1
jax: 0.10.0
libtpu: 0.0.40
codegen_flags: <defaults>
</compile_context>

<pallas_src>
import jax
import jax.numpy as jnp
from jax.experimental import pallas as pl
from jax.experimental.pallas import tpu as pltpu

LANE = 128        # vreg lane width: pad last dims to this for unmasked stores
SUBLANE = 8


def _round_up(n: int, m: int) -> int:
    return ((n + m - 1) // m) * m


def dansenet_kernel(x_ref, w1_ref, b1_ref, w2_ref, b2_ref, out_ref):
    """out = sigmoid(x @ w1 + b1) @ w2 + b2 for one (TB, *) batch tile."""
    # First matmul on the MXU, f32 accumulation.
    h = jnp.dot(x_ref[...], w1_ref[...], preferred_element_type=jnp.float32)
    h = h + b1_ref[...]                                   # (TB, Hp) + (1, Hp)
    # Sigmoid via EUP: exp(-h) and an approximate reciprocal, keeping the
    # transcendental work off the VALU/MXU slots.
    h = pl.reciprocal(1.0 + jnp.exp(-h), approx=True)
    # Second matmul; cast activations to the weight dtype (bf16 fast path).
    o = jnp.dot(h.astype(w2_ref.dtype), w2_ref[...],
                preferred_element_type=jnp.float32)
    o = o + b2_ref[...]                                   # (TB, Op) + (1, Op)
    out_ref[...] = o.astype(out_ref.dtype)


def dansenet_forward(x, w1, b1, w2, b2, *, compute_dtype=None, block_b=128):
    """Fused DanseNet forward. x: [B, D_in], w1: [D_in, H], b1: [1, H],
    w2: [H, D_out], b2: [1, D_out]. Returns [B, D_out] in x.dtype."""
    B, D_in = x.shape
    H = w1.shape[1]
    D_out = w2.shape[1]
    out_dtype = x.dtype
    compute_dtype = compute_dtype or x.dtype

    # block_b must be a sublane multiple (use 16 so bf16 packing is happy too).
    assert block_b % 16 == 0

    # Pad feature dims to 128 lanes and batch to a whole number of tiles.
    # Zero padding keeps the math exact (see header comment).
    Dip = _round_up(D_in, LANE)
    Hp = _round_up(H, LANE)
    Dop = _round_up(D_out, LANE)
    Bp = _round_up(B, block_b)

    xp = jnp.pad(x, ((0, Bp - B), (0, Dip - D_in))).astype(compute_dtype)
    w1p = jnp.pad(w1, ((0, Dip - D_in), (0, Hp - H))).astype(compute_dtype)
    b1p = jnp.pad(b1, ((0, 0), (0, Hp - H))).astype(jnp.float32)
    w2p = jnp.pad(w2, ((0, Hp - H), (0, Dop - D_out))).astype(compute_dtype)
    b2p = jnp.pad(b2, ((0, 0), (0, Dop - D_out))).astype(jnp.float32)

    grid = (Bp // block_b,)

    out_padded = pl.pallas_call(
        dansenet_kernel,
        out_shape=jax.ShapeDtypeStruct((Bp, Dop), out_dtype),
        grid=grid,
        in_specs=[
            # batch-tiled input: new (block_b, Dip) tile per grid step
            pl.BlockSpec((block_b, Dip), lambda i: (i, 0)),
            # weights / biases: constant index_map -> stay VMEM-resident
            pl.BlockSpec((Dip, Hp), lambda i: (0, 0)),
            pl.BlockSpec((1, Hp), lambda i: (0, 0)),
            pl.BlockSpec((Hp, Dop), lambda i: (0, 0)),
            pl.BlockSpec((1, Dop), lambda i: (0, 0)),
        ],
        out_specs=pl.BlockSpec((block_b, Dop), lambda i: (i, 0)),
        compiler_params=pltpu.CompilerParams(
            # batch tiles are independent -> shard across v7x's 2 TCs
            dimension_semantics=("parallel",),
            # conservative budget that fits every generation (v7x: 64 MiB/TC)
            vmem_limit_bytes=32 * 1024 * 1024,
        ),
    )(xp, w1p, b1p, w2p, b2p)

    return out_padded[:B, :D_out]


def init_params(key, input_dim, hidden_dim, output_dim, dtype=jnp.float32):
    """Deterministic init mimicking nn.Linear's U(-1/sqrt(fan_in), 1/sqrt(fan_in))."""
    k1, k2, k3, k4 = jax.random.split(key, 4)
    bound1 = 1.0 / jnp.sqrt(input_dim)
    bound2 = 1.0 / jnp.sqrt(hidden_dim)
    w1 = jax.random.uniform(k1, (input_dim, hidden_dim), dtype, -bound1, bound1)
    b1 = jax.random.uniform(k2, (1, hidden_dim), dtype, -bound1, bound1)
    w2 = jax.random.uniform(k3, (hidden_dim, output_dim), dtype, -bound2, bound2)
    b2 = jax.random.uniform(k4, (1, output_dim), dtype, -bound2, bound2)
    return w1, b1, w2, b2


if __name__ == "__main__":
    # Small logical shapes matching the module; batch large enough to exercise
    # the 2-step batch grid (2 x 128-row tiles).
    B, input_dim, hidden_dim, output_dim = 256, 16, 32, 8

    key = jax.random.PRNGKey(0)
    kx, kp = jax.random.split(key)
    x = jax.random.normal(kx, (B, input_dim), jnp.float32)
    w1, b1, w2, b2 = init_params(kp, input_dim, hidden_dim, output_dim)

    # Pure-JAX reference (same math as the PyTorch forward).
    ref_h = jax.nn.sigmoid(x @ w1 + b1)
    ref_o = ref_h @ w2 + b2

    # f32 path (tolerance loosened slightly for the approx-EUP reciprocal
    # inside the sigmoid).
    out_f32 = jax.block_until_ready(dansenet_forward(x, w1, b1, w2, b2))
    assert out_f32.shape == (B, output_dim)
    assert jnp.allclose(out_f32, ref_o, atol=2e-3, rtol=2e-3)

    # bf16 fast path (v6e/v7x MXU) with f32 accumulation.
    out_bf16 = jax.block_until_ready(
        dansenet_forward(x, w1, b1, w2, b2, compute_dtype=jnp.bfloat16))
    assert out_bf16.shape == (B, output_dim)
    assert jnp.allclose(out_bf16, ref_o, atol=5e-2, rtol=5e-2)

    print("KERNEL_OK")
</pallas_src>

<mosaic_0001>
module attributes {stable_mosaic.version = 11 : i64} {
  func.func @dansenet_kernel(%arg0: i32, %arg1: memref<128x128xf32, #tpu.memory_space<vmem>>, %arg2: memref<128x128xf32, #tpu.memory_space<vmem>>, %arg3: memref<1x128xf32, #tpu.memory_space<vmem>>, %arg4: memref<128x128xf32, #tpu.memory_space<vmem>>, %arg5: memref<1x128xf32, #tpu.memory_space<vmem>>, %arg6: memref<128x128xf32, #tpu.memory_space<vmem>>) attributes {dimension_semantics = [#tpu.dimension_semantics<parallel>], iteration_bounds = array<i64: 2>, scalar_prefetch = 0 : i64, scratch_operands = 0 : i64, tpu.core_type = #tpu.core_type<tc>, window_params = [{transform_indices = @transform_0, window_bounds = array<i64: 128, 128>}, {pipeline_mode = #tpu.pipeline_mode<synchronous>, transform_indices = @transform_1, window_bounds = array<i64: 128, 128>}, {pipeline_mode = #tpu.pipeline_mode<synchronous>, transform_indices = @transform_2, window_bounds = array<i64: 1, 128>}, {pipeline_mode = #tpu.pipeline_mode<synchronous>, transform_indices = @transform_3, window_bounds = array<i64: 128, 128>}, {pipeline_mode = #tpu.pipeline_mode<synchronous>, transform_indices = @transform_4, window_bounds = array<i64: 1, 128>}, {transform_indices = @transform_5, window_bounds = array<i64: 128, 128>}]} {
    %c0 = arith.constant 0 : index
    %c0_0 = arith.constant 0 : index
    %0 = vector.load %arg1[%c0, %c0_0] : memref<128x128xf32, #tpu.memory_space<vmem>>, vector<128x128xf32>
    %c0_1 = arith.constant 0 : index
    %c0_2 = arith.constant 0 : index
    %1 = vector.load %arg2[%c0_1, %c0_2] : memref<128x128xf32, #tpu.memory_space<vmem>>, vector<128x128xf32>
    %cst = arith.constant dense<0.000000e+00> : vector<128x128xf32>
    %2 = tpu.matmul %0, %1, %cst {dimension_numbers = #tpu.dot_dimension_numbers<[1], [0], [0], [1], [0, 0, 1, 1], [], []>} : vector<128x128xf32>, vector<128x128xf32>, vector<128x128xf32> -> vector<128x128xf32>
    %c0_3 = arith.constant 0 : index
    %c0_4 = arith.constant 0 : index
    %3 = vector.load %arg3[%c0_3, %c0_4] : memref<1x128xf32, #tpu.memory_space<vmem>>, vector<1x128xf32>
    %4 = vector.broadcast %3 : vector<1x128xf32> to vector<128x128xf32>
    %5 = arith.addf %2, %4 : vector<128x128xf32>
    %cst_5 = arith.constant 0.000000e+00 : f32
    %6 = vector.broadcast %cst_5 : f32 to vector<128x128xf32>
    %7 = arith.subf %6, %5 : vector<128x128xf32>
    %8 = math.exp %7 : vector<128x128xf32>
    %cst_6 = arith.constant 1.000000e+00 : f32
    %9 = vector.broadcast %cst_6 : f32 to vector<128x128xf32>
    %10 = arith.addf %9, %8 : vector<128x128xf32>
    %11 = tpu.reciprocal %10 {approx = true} : vector<128x128xf32> -> vector<128x128xf32>
    %c0_7 = arith.constant 0 : index
    %c0_8 = arith.constant 0 : index
    %12 = vector.load %arg4[%c0_7, %c0_8] : memref<128x128xf32, #tpu.memory_space<vmem>>, vector<128x128xf32>
    %cst_9 = arith.constant dense<0.000000e+00> : vector<128x128xf32>
    %13 = tpu.matmul %11, %12, %cst_9 {dimension_numbers = #tpu.dot_dimension_numbers<[1], [0], [0], [1], [0, 0, 1, 1], [], []>} : vector<128x128xf32>, vector<128x128xf32>, vector<128x128xf32> -> vector<128x128xf32>
    %c0_10 = arith.constant 0 : index
    %c0_11 = arith.constant 0 : index
    %14 = vector.load %arg5[%c0_10, %c0_11] : memref<1x128xf32, #tpu.memory_space<vmem>>, vector<1x128xf32>
    %15 = vector.broadcast %14 : vector<1x128xf32> to vector<128x128xf32>
    %16 = arith.addf %13, %15 : vector<128x128xf32>
    %c0_12 = arith.constant 0 : index
    %c0_13 = arith.constant 0 : index
    %17 = vector.load %arg6[%c0_12, %c0_13] : memref<128x128xf32, #tpu.memory_space<vmem>>, vector<128x128xf32>
    tpu.vector_store %arg6[%c0_12, %c0_13], %16 {strides = array<i32>} : memref<128x128xf32, #tpu.memory_space<vmem>>, vector<128x128xf32>,
    return
  }
  func.func @transform_0(%arg0: i32) -> (i32, i32) {
    %c0_i32 = arith.constant 0 : i32
    %c0_i32_0 = arith.constant 0 : i32
    return %arg0, %c0_i32 : i32, i32
  }
  func.func @transform_1(%arg0: i32) -> (i32, i32) {
    %c0_i32 = arith.constant 0 : i32
    %c0_i32_0 = arith.constant 0 : i32
    %c0_i32_1 = arith.constant 0 : i32
    return %c0_i32, %c0_i32_0 : i32, i32
  }
  func.func @transform_2(%arg0: i32) -> (i32, i32) {
    %c0_i32 = arith.constant 0 : i32
    %c0_i32_0 = arith.constant 0 : i32
    %c0_i32_1 = arith.constant 0 : i32
    return %c0_i32, %c0_i32_0 : i32, i32
  }
  func.func @transform_3(%arg0: i32) -> (i32, i32) {
    %c0_i32 = arith.constant 0 : i32
    %c0_i32_0 = arith.constant 0 : i32
    %c0_i32_1 = arith.constant 0 : i32
    return %c0_i32, %c0_i32_0 : i32, i32
  }
  func.func @transform_4(%arg0: i32) -> (i32, i32) {
    %c0_i32 = arith.constant 0 : i32
    %c0_i32_0 = arith.constant 0 : i32
    %c0_i32_1 = arith.constant 0 : i32
    return %c0_i32, %c0_i32_0 : i32, i32
  }
  func.func @transform_5(%arg0: i32) -> (i32, i32) {
    %c0_i32 = arith.constant 0 : i32
    %c0_i32_0 = arith.constant 0 : i32
    return %arg0, %c0_i32 : i32, i32
  }
}

</mosaic_0001>

<bundles_post_ra>
// kernel: tpu_custom_call.1
= control target key start
LH: loop header
LB: loop body
LE: loop exit
PB: predicated region body
PF: predicated region fallthrough
CT: control target
= control target key end

     0   :  { %10 = vsyncpa [#allocation3], 0  ;;  %s1611_s0 = inlined_call_operand.hbm [shape: f32[256,128], index: 0, kind: input, shape index: {}]   ;;  %s1612_s1 = inlined_call_operand.hbm [shape: f32[128,128], index: 1, kind: input, shape index: {}]   ;;  %s1613_s2 = inlined_call_operand.vmem [shape: f32[1,128], index: 2, kind: input, shape index: {}]   ;;  %s1614_s3 = inlined_call_operand.hbm [shape: f32[128,128], index: 3, kind: input, shape index: {}]   ;;  %s1615_s4 = inlined_call_operand.vmem [shape: f32[1,128], index: 4, kind: input, shape index: {}]   ;;  %s1616_s5 = inlined_call_operand.hbm [shape: f32[256,128], index: 5, kind: output, shape index: {}]  }
   0x1   :  { %12 = vsyncpa [#allocation3 + $0x1], 0 }
   0x2   :  { %13 = vsyncpa [#allocation6], 0 }
   0x3   :  { %14 = vsyncpa [#allocation4], 0 }
   0x4   :  { %16 = vsyncpa [#allocation4 + $0x1], 0  ;;  %s1349_s18 = smov 0   ;;  %s1351_s19 = smov 0  }
   0x5   :  { %s1353_s20 = smov 0   ;;  %s1355_s21 = smov 0  }
   0x6 LB: > { %s1370_s22 = sadd.s32 4294967295, %s1309_s21   ;;  %s828_s23 = sadd.s32 4294967294, %s1309_s21   ;;  %s1309_s21 = sphi %s1355_s21, %s1639_s21   ;;  %s1305_s20 = sphi %s1353_s20, %s1638_s20   ;;  %s1301_s19 = sphi %s1351_s19, %s1637_s19   ;;  %s1297_s18 = sphi %s1349_s18, %s1636_s18  }
   0x7   : > { %p42_p0 = scmp.ne.s32.totalorder %s1301_s19, %s1297_s18  ;;  %p1617_p1 = scmp.eq.s32.totalorder %s1370_s22, 0 }
   0x8   : > { %p150_p2 = scmp.eq.s32.totalorder %s1370_s22, 1  ;;  %p156_p3 = scmp.eq.s32.totalorder %s828_s23, 1 }
   0x9   : > { %p1379_p4 = por %p1617_p1, %p42_p0  ;;  %p829_p5 = scmp.ge.s32.totalorder %s1309_s21, 1 }
   0xa   : > { %p1384_p6 = por %p156_p3, %p42_p0  ;;  %p163_p7 = scmp.lt.s32.totalorder %s1309_s21, 3 }
   0xb   : > { %s1622_s24 = scalar_select %p1379_p4, 1, 0 }
   0xc   : > { %s1623_s25 = scalar_select %p1384_p6, 1, 0 }
   0xd   : > { %p1389_p8 = pnand %p829_p5, %p163_p7  ;;  %s1311_s27 = smov [#allocation5]  }
   0xe   : > { %s175_s28 = sshll.u32 %s1311_s27, 4  ;;  %s1312_s30 = smov [#allocation7]   ;;  %s176_s28 = int_to_ptr.vmem [resolvable:$true] %s175_s28 }
   0xf   : > { %s1624_s26 = scalar_select %p1389_p8, 1, 0 }
  0x10   : > { %p1038_p9 = pneg %p1389_p8  ;;  %s191_s6 = sshll.u32 %s1312_s30, 4  ;;  %s192_s6 = int_to_ptr.vmem [resolvable:$true] %s191_s6 }
  0x11   : > { %s1172_s7 = scalar_lea.vmem %s176_s28, 2048  ;;  %p1180_p5 = scmp.lt.s32.totalorder %s176_s28, %s176_s28 }
  0x12   : > { %p1398_p11 = pnand %p1038_p9, %p1617_p1  ;;  %p1173_p13 = scmp.ne.s32.totalorder %s176_s28, %s1172_s7 }
  0x13   : > { %p1181_p7 = scmp.lt.s32.totalorder %s1172_s7, %s1172_s7 }
  0x14   : > { %p1163_p12 = pneg %p1398_p11 }
  0x15   : > { %p1182_p10 = por %p1181_p7, %p1180_p5 }
  0x16   : > { %p1175_p0 = pnand %p1173_p13, %p1163_p12 }
  0x18   : > { %p1176_p3 = pneg %p1175_p0 }
  0x1a   : > { %p1183_p9 = pnand %p1182_p10, %p1176_p3 }
  0x1c   : > { %1186 = shalt.err (!%p1183_p9)
}
  0x1d   : > { %s1618_s8 = smov 128   ;;  %s1314_s9 = smov 8  }
  0x1e   : > { %1041 = dma.hbm_to_vmem [thread:$0]  (!%p1398_p11), %s1612_s1, 2048, %s176_s28, [#allocation6], %s1618_s8, %s1618_s8, %s1314_s9  }
  0x1f   : > { %s1198_s12 = scalar_lea.vmem %s192_s6, 2048  ;;  %p1206_p10 = scmp.lt.s32.totalorder %s192_s6, %s192_s6 }
  0x20   : > { %p1199_p13 = scmp.ne.s32.totalorder %s192_s6, %s1198_s12  ;;  %p1207_p3 = scmp.lt.s32.totalorder %s1198_s12, %s1198_s12 }
  0x22   : > { %p1201_p0 = pnand %p1199_p13, %p1163_p12  ;;  %p1208_p7 = por %p1207_p3, %p1206_p10 }
  0x24   : > { %p1202_p5 = pneg %p1201_p0 }
  0x26   : > { %p1209_p9 = pnand %p1208_p7, %p1202_p5 }
  0x28   : > { %1212 = shalt.err (!%p1209_p9)
}
  0x29   : > { %1044 = dma.hbm_to_vmem [thread:$0]  (!%p1398_p11), %s1614_s3, 2048, %s192_s6, [#allocation6], %s1618_s8, %s1618_s8, %s1314_s9  }
  0x2a   : > { %s1427_s15 = sadd.s32 1, %s1309_s21   ;;  %s29_s16 = sadd.s32 1, %s1305_s20 }
  0x2b   : > { %s26_s17 = ssub.s32 %s1309_s21, %s1427_s15  ;;  %p36_p12 = scmp.ne.s32.totalorder %s1305_s20, %s1301_s19 }
  0x2c   : > { %p27_p13 = scmp.eq.s32.totalorder %s26_s17, 0  ;;  %p37_p0 = scmp.eq.s32.totalorder %s1309_s21, 0 }
  0x2d   : > { %p1437_p5 = por %p150_p2, %p36_p12  ;;  %p1055_p10 = scmp.lt.s32.totalorder %s1309_s21, 2 }
  0x2e   : > { %s1443_s27 = scalar_select %p27_p13, %s1305_s20, %s29_s16  }
  0x2f   : > { %s1626_s23 = scalar_select %p1437_p5, 1, 0 }
  0x30   : > { %p38_p3 = por %p37_p0, %p36_p12  ;;  %s208_s28 = sand.u32 1, %s1305_s20  }
  0x31   : > { %s833_s29 = sshll.u32 %s208_s28, 7  ;;  %s848_s30 = sshll.u32 %s1309_s21, 11 }
  0x32   : > { %s1450_s10 = scalar_lea.hbm %s1611_s0, %s848_s30  ;;  %s212_s11 = scalar_lea.vmem [#allocation2], %s833_s29 }
  0x33   : > { %s219_s12 = sshll.u32 %s212_s11, 4  ;;  %p1454_p2 = pnand %p1055_p10, %p38_p3  ;;  %s1452_s12 = int_to_ptr.vmem [resolvable:$true] %s219_s12 }
  0x34   : > { %s1458_s14 = scalar_lea.sflag [#allocation3], %s208_s28  ;;  %s1213_s16 = scalar_lea.hbm %s1450_s10, 2048 }
  0x35   : > { %p1214_p11 = scmp.ne.s32.totalorder %s1450_s10, %s1213_s16  ;;  %p1215_p7 = pneg %p1454_p2 }
  0x36   : > { %s1218_s29 = scalar_lea.hbm %s1611_s0, 4096  ;;  %p1219_p13 = scmp.lt.s32.totalorder %s1450_s10, %s1611_s0 }
  0x37   : > { %p1216_p9 = pnand %p1215_p7, %p1214_p11  ;;  %p1220_p0 = scmp.lt.s32.totalorder %s1218_s29, %s1213_s16 }
  0x39   : > { %p1217_p12 = pneg %p1216_p9  ;;  %p1221_p10 = por %p1220_p0, %p1219_p13 }
  0x3b   : > { %p1222_p3 = pnand %p1221_p10, %p1217_p12 }
  0x3d   : > { %1225 = shalt.err (!%p1222_p3)
}
  0x3e   : > { %s1226_s28 = scalar_lea.vmem %s1452_s12, 2048  ;;  %s1315_s11 = smov [#allocation2]  }
  0x3f   : > { %p1227_p1 = scmp.ne.s32.totalorder %s1452_s12, %s1226_s28  ;;  %s1231_s8 = sshll.u32 %s1315_s11, 4  ;;  %s1232_s8 = int_to_ptr.vmem [resolvable:$false] %s1231_s8 }
  0x40   : > { %s1233_s17 = scalar_lea.vmem %s1232_s8, 4096  ;;  %p1234_p9 = scmp.lt.s32.totalorder %s1452_s12, %s1232_s8 }
  0x41   : > { %p1229_p6 = pnand %p1227_p1, %p1215_p7  ;;  %p1235_p5 = scmp.lt.s32.totalorder %s1233_s17, %s1226_s28 }
  0x43   : > { %p1230_p11 = pneg %p1229_p6  ;;  %p1236_p4 = por %p1235_p5, %p1234_p9 }
  0x45   : > { %p1237_p8 = pnand %p1236_p4, %p1230_p11 }
  0x47   : > { %1240 = shalt.err (!%p1237_p8)
}
  0x48   : > { %s1628_s16 = smov 128   ;;  %p1629_p1 = scmp.ne.s32.totalorder %s1624_s26, 0 }
  0x49   : > { %1048 = dma.hbm_to_vmem [thread:$0]  (!%p1454_p2), %s1450_s10, 2048, %s1452_s12, %s1458_s14, %s1628_s16, %s1628_s16, %s1314_s9  }
  0x4a   : > { %231 = sbr.rel (%p1629_p1) target bundleno = 588 (0x24c), region = 40  ;;  %s1485_s30 = sand.u32 (!%p1629_p1), 1, %s1301_s19  }
  0x4b   : > { %s837_s8 = sshll.u32 (!%p1629_p1), %s1485_s30, 7  ;;  %s234_s29 = scalar_lea.sflag (!%p1629_p1), [#allocation3], %s1485_s30 }
  0x4c   : > { %s1491_s13 = scalar_lea.vmem (!%p1629_p1), [#allocation2], %s837_s8  ;;  %p1630_p4 = scmp.ne.s32.totalorder (!%p1629_p1), %s1622_s24, 0 }
  0x4f   : > { %1284 = dma.done.wait (%p1630_p4), %s234_s29, 2048  }
  0x50   : > { %1286 = vsyncadd (%p1630_p4), %s234_s29, 4294965248  ;;  %p1631_p6 = scmp.eq.s32.totalorder %s1370_s22, 0 }
  0x52   : > { %1288 = dma.done.wait (%p1631_p6), [#allocation6], 4096   ;;  %p1632_p8 = pmov %p1631_p6 }
  0x53   : > { %v305_v0 = vld [vmem:[#allocation5 + $0x78] sm:$0xff]  ;;  %v304_v1 = vld [vmem:[#allocation5 + $0x70] sm:$0xff]  ;;  %v303_v2 = vld [vmem:[#allocation5 + $0x68] sm:$0xff]  ;;  %s1543_s12 = scalar_lea.vmem [#allocation8], %s837_s8  ;;  %s849_s14 = sshll.u32 %s1370_s22, 11 }
  0x54   : > { %1290 = vsyncadd (%p1632_p8), [#allocation6], 4294963200  ;;  %914 = vmatprep.subr.mxu0 %v305_v0  ;;  %v302_v3 = vld [vmem:[#allocation5 + $0x60] sm:$0xff]  ;;  %v301_v5 = vld [vmem:[#allocation5 + $0x58] sm:$0xff]  ;;  %s736_s6 = sshll.u32 %s1543_s12, 4  ;;  %s1564_s11 = scalar_lea.hbm %s1616_s5, %s849_s14  ;;  %s1566_s6 = int_to_ptr.vmem [resolvable:$true] %s736_s6 }
  0x55   : > { %915 = vmatpush3.msra.mxu0 %v305_v0  ;;  %v274_v4 = vld [vmem:[%s1491_s13] sm:$0xff]  ;;  %v300_v6 = vld [vmem:[#allocation5 + $0x50] sm:$0xff]  ;;  %v299_v7 = vld [vmem:[#allocation5 + $0x48] sm:$0xff]  ;;  %s723_s17 = scalar_lea.sflag [#allocation4], %s1485_s30  ;;  %s1241_s22 = scalar_lea.vmem %s1566_s6, 2048 }
  0x56   : > { %916 = vmatprep.subr.mxu0 %v304_v1  ;;  %946 = vmatprep.mubr.f32.mxu0 %v274_v4  ;;  %v298_v8 = vld [vmem:[#allocation5 + $0x40] sm:$0xff]  ;;  %v297_v9 = vld [vmem:[#allocation5 + $0x38] sm:$0xff]  ;;  %v296_v10 = vld [vmem:[#allocation5 + $0x30] sm:$0xff]  ;;  %p1242_p5 = scmp.ne.s32.totalorder %s1566_s6, %s1241_s22  ;;  %p1633_p2 = scmp.ne.s32.totalorder %s1626_s23, 0 }
  0x57   : > { %917 = vmatpush3.msra.mxu0 %v304_v1  ;;  %v295_v11 = vld [vmem:[#allocation5 + $0x28] sm:$0xff]  ;;  %v294_v12 = vld [vmem:[#allocation5 + $0x20] sm:$0xff]  ;;  %v293_v13 = vld [vmem:[#allocation5 + $0x18] sm:$0xff]  ;;  %s1316_s16 = smov [#allocation8]  }
  0x58   : > { %918 = vmatprep.subr.mxu0 %v303_v2  ;;  %v292_v14 = vld [vmem:[#allocation5 + $0x10] sm:$0xff]  ;;  %v291_v15 = vld [vmem:[#allocation5 + $0x8] sm:$0xff]  ;;  %v290_v16 = vld [vmem:[#allocation5] sm:$0xff]  ;;  %p1243_p7 = pnand %p1242_p5, %p1633_p2  ;;  %s1245_s8 = sshll.u32 %s1316_s16, 4  ;;  %s1246_s8 = int_to_ptr.vmem [resolvable:$false] %s1245_s8 }
  0x59   : > { %919 = vmatpush3.msra.mxu0 %v303_v2  ;;  %v275_v17 = vld [vmem:[%s1491_s13 + $0x8] sm:$0xff]  ;;  %v276_v18 = vld [vmem:[%s1491_s13 + $0x10] sm:$0xff]  ;;  %v277_v19 = vld [vmem:[%s1491_s13 + $0x18] sm:$0xff]  ;;  %s1247_s29 = scalar_lea.vmem %s1246_s8, 4096  ;;  %p1248_p13 = scmp.lt.s32.totalorder %s1566_s6, %s1246_s8 }
  0x5a   : > { %920 = vmatprep.subr.mxu0 %v302_v3  ;;  %v278_v20 = vld [vmem:[%s1491_s13 + $0x20] sm:$0xff]  ;;  %v279_v21 = vld [vmem:[%s1491_s13 + $0x28] sm:$0xff]  ;;  %v280_v22 = vld [vmem:[%s1491_s13 + $0x30] sm:$0xff]  ;;  %p1244_p12 = pneg %p1243_p7  ;;  %p1249_p0 = scmp.lt.s32.totalorder %s1247_s29, %s1241_s22 }
  0x5b   : > { %921 = vmatpush3.msra.mxu0 %v302_v3  ;;  %v281_v23 = vld [vmem:[%s1491_s13 + $0x38] sm:$0xff]  ;;  %v282_v24 = vld [vmem:[%s1491_s13 + $0x40] sm:$0xff]  ;;  %v283_v25 = vld [vmem:[%s1491_s13 + $0x48] sm:$0xff] }
  0x5c   : > { %922 = vmatprep.subr.mxu0 %v301_v5  ;;  %v284_v26 = vld [vmem:[%s1491_s13 + $0x50] sm:$0xff]  ;;  %v285_v27 = vld [vmem:[%s1491_s13 + $0x58] sm:$0xff]  ;;  %v286_v28 = vld [vmem:[%s1491_s13 + $0x60] sm:$0xff]  ;;  %p1250_p10 = por %p1249_p0, %p1248_p13 }
  0x5d   : > { %923 = vmatpush3.msra.mxu0 %v301_v5  ;;  %v287_v29 = vld [vmem:[%s1491_s13 + $0x68] sm:$0xff]  ;;  %v288_v30 = vld [vmem:[%s1491_s13 + $0x70] sm:$0xff]  ;;  %v289_v31 = vld [vmem:[%s1491_s13 + $0x78] sm:$0xff] }
  0x5e   : > { %924 = vmatprep.subr.mxu0 %v300_v6  ;;  %v553_v32 = vld [vmem:[#allocation7 + $0x78] sm:$0xff]  ;;  %v552_v33 = vld [vmem:[#allocation7 + $0x70] sm:$0xff]  ;;  %v551_v34 = vld [vmem:[#allocation7 + $0x68] sm:$0xff]  ;;  %p1251_p3 = pnand %p1250_p10, %p1244_p12 }
  0x5f   : > { %925 = vmatpush3.msra.mxu0 %v300_v6  ;;  %970 = vmatprep.subr.mxu1 %v553_v32  ;;  %v550_v35 = vld [vmem:[#allocation7 + $0x60] sm:$0xff]  ;;  %v549_v36 = vld [vmem:[#allocation7 + $0x58] sm:$0xff]  ;;  %v548_v37 = vld [vmem:[#allocation7 + $0x50] sm:$0xff] }
  0x60   : > { %926 = vmatprep.subr.mxu0 %v299_v7  ;;  %971 = vmatpush3.msra.mxu1 %v553_v32  ;;  %v547_v38 = vld [vmem:[#allocation7 + $0x48] sm:$0xff]  ;;  %v546_v39 = vld [vmem:[#allocation7 + $0x40] sm:$0xff]  ;;  %v545_v40 = vld [vmem:[#allocation7 + $0x38] sm:$0xff] }
  0x61   : > { %927 = vmatpush3.msra.mxu0 %v299_v7  ;;  %972 = vmatprep.subr.mxu1 %v552_v33  ;;  %v544_v41 = vld [vmem:[#allocation7 + $0x30] sm:$0xff]  ;;  %v543_v42 = vld [vmem:[#allocation7 + $0x28] sm:$0xff]  ;;  %v542_v43 = vld [vmem:[#allocation7 + $0x20] sm:$0xff] }
  0x62   : > { %928 = vmatprep.subr.mxu0 %v298_v8  ;;  %973 = vmatpush3.msra.mxu1 %v552_v33  ;;  %v541_v44 = vld [vmem:[#allocation7 + $0x18] sm:$0xff]  ;;  %v540_v45 = vld [vmem:[#allocation7 + $0x10] sm:$0xff]  ;;  %v539_v46 = vld [vmem:[#allocation7 + $0x8] sm:$0xff] }
  0x63   : > { %929 = vmatpush3.msra.mxu0 %v298_v8  ;;  %974 = vmatprep.subr.mxu1 %v551_v34  ;;  %v538_v47 = vld [vmem:[#allocation7] sm:$0xff] }
  0x64   : > { %930 = vmatprep.subr.mxu0 %v297_v9  ;;  %975 = vmatpush3.msra.mxu1 %v551_v34  ;;  %v1520_v48 = vld [vmem:[%s1613_s2] ss:$0 sm:$0xff] }
  0x65   : > { %931 = vmatpush3.msra.mxu0 %v297_v9  ;;  %976 = vmatprep.subr.mxu1 %v550_v35 }
  0x66   : > { %932 = vmatprep.subr.mxu0 %v296_v10  ;;  %977 = vmatpush3.msra.mxu1 %v550_v35 }
  0x67   : > { %933 = vmatpush3.msra.mxu0 %v296_v10  ;;  %978 = vmatprep.subr.mxu1 %v549_v36 }
  0x68   : > { %934 = vmatprep.subr.mxu0 %v295_v11  ;;  %979 = vmatpush3.msra.mxu1 %v549_v36 }
  0x69   : > { %935 = vmatpush3.msra.mxu0 %v295_v11  ;;  %980 = vmatprep.subr.mxu1 %v548_v37 }
  0x6a   : > { %936 = vmatprep.subr.mxu0 %v294_v12  ;;  %981 = vmatpush3.msra.mxu1 %v548_v37 }
  0x6b   : > { %937 = vmatpush3.msra.mxu0 %v294_v12  ;;  %982 = vmatprep.subr.mxu1 %v547_v38 }
  0x6c   : > { %938 = vmatprep.subr.mxu0 %v293_v13  ;;  %983 = vmatpush3.msra.mxu1 %v547_v38 }
  0x6d   : > { %939 = vmatpush3.msra.mxu0 %v293_v13  ;;  %984 = vmatprep.subr.mxu1 %v546_v39 }
  0x6e   : > { %940 = vmatprep.subr.mxu0 %v292_v14  ;;  %985 = vmatpush3.msra.mxu1 %v546_v39 }
  0x6f   : > { %941 = vmatpush3.msra.mxu0 %v292_v14  ;;  %986 = vmatprep.subr.mxu1 %v545_v40 }
  0x70   : > { %942 = vmatprep.subr.mxu0 %v291_v15  ;;  %987 = vmatpush3.msra.mxu1 %v545_v40 }
  0x71   : > { %943 = vmatpush3.msra.mxu0 %v291_v15  ;;  %988 = vmatprep.subr.mxu1 %v544_v41 }
  0x72   : > { %944 = vmatprep.subr.mxu0 %v290_v16  ;;  %989 = vmatpush3.msra.mxu1 %v544_v41 }
  0x73   : > { %945 = vmatpush3.msra.mxu0 %v290_v16  ;;  %990 = vmatprep.subr.mxu1 %v543_v42 }
  0x74   : > { %947 = vmatmul.mubr.f32.vlgmr.msra.gmra.mxu0 %v275_v17  ;;  %991 = vmatpush3.msra.mxu1 %v543_v42 }
  0x75   : > { %949 = vmatprep.mubr.f32.mxu0 %v276_v18  ;;  %992 = vmatprep.subr.mxu1 %v542_v43 }
  0x76   : > { %993 = vmatpush3.msra.mxu1 %v542_v43 }
  0x77   : > { %994 = vmatprep.subr.mxu1 %v541_v44 }
  0x78   : > { %950 = vmatmul.mubr.f32.gmra.mxu0 %v277_v19  ;;  %995 = vmatpush3.msra.mxu1 %v541_v44 }
  0x79   : > { %952 = vmatprep.mubr.f32.mxu0 %v278_v20  ;;  %996 = vmatprep.subr.mxu1 %v540_v45 }
  0x7a   : > { %997 = vmatpush3.msra.mxu1 %v540_v45 }
  0x7b   : > { %998 = vmatprep.subr.mxu1 %v539_v46 }
  0x7c   : > { %953 = vmatmul.mubr.f32.gmra.mxu0 %v279_v21  ;;  %999 = vmatpush3.msra.mxu1 %v539_v46 }
  0x7d   : > { %955 = vmatprep.mubr.f32.mxu0 %v280_v22  ;;  %1000 = vmatprep.subr.mxu1 %v538_v47 }
  0x7e   : > { %1001 = vmatpush3.msra.mxu1 %v538_v47 }
  0x80   : > { %956 = vmatmul.mubr.f32.gmra.mxu0 %v281_v23 }
  0x81   : > { %958 = vmatprep.mubr.f32.mxu0 %v282_v24 }
  0x84   : > { %959 = vmatmul.mubr.f32.gmra.mxu0 %v283_v25 }
  0x85   : > { %961 = vmatprep.mubr.f32.mxu0 %v284_v26 }
  0x88   : > { %962 = vmatmul.mubr.f32.gmra.mxu0 %v285_v27 }
  0x89   : > { %964 = vmatprep.mubr.f32.mxu0 %v286_v28 }
  0x8c   : > { %965 = vmatmul.mubr.f32.gmra.mxu0 %v287_v29 }
  0x8d   : > { %967 = vmatprep.mubr.f32.mxu0 %v288_v30 }
  0x90   : > { %968 = vmatmul.mubr.f32.gmra.mxu0 %v289_v31 }
 0x134   : > { %v948_v49 = vpop.f32.mrf.mxu0 }
 0x135   : > { %v385_v50 = vadd.f32 %v948_v49, %v1520_v48 }
 0x136   : > { %v379_v51 = vpop.f32.mrf.mxu0 }
 0x137   : > { %v459_v52 = vsub.f32 0.0, %v385_v50  ;;  %v380_v53 = vadd.f32 %v1520_v48, %v379_v51 }
 0x138   : > { %v951_v54 = vpop.f32.mrf.mxu0 }
 0x139   : > { %v476_v55 = vmul.f32 1.442695, %v459_v52  ;;  %v458_v56 = vsub.f32 0.0, %v380_v53  ;;  %v395_v57 = vadd.f32 %v951_v54, %v1520_v48 }
 0x13a   : > { %v389_v58 = vpop.f32.mrf.mxu0 }
 0x13b   : > { %1097 = vpow2.f32 %v476_v55  ;;  %v474_v59 = vmul.f32 1.442695, %v458_v56  ;;  %v461_v60 = vsub.f32 0.0, %v395_v57  ;;  %v390_v61 = vadd.f32 %v1520_v48, %v389_v58 }
 0x13c   : > { %v954_v62 = vpop.f32.mrf.mxu0 }
 0x13d   : > { %1099 = vpow2.f32 %v474_v59  ;;  %v480_v63 = vmul.f32 1.442695, %v461_v60  ;;  %v460_v0 = vsub.f32 0.0, %v390_v61  ;;  %v405_v1 = vadd.f32 %v954_v62, %v1520_v48 }
 0x13e   : > { %v399_v2 = vpop.f32.mrf.mxu0 }
 0x13f   : > { %1101 = vpow2.f32 %v480_v63  ;;  %v478_v3 = vmul.f32 1.442695, %v460_v0  ;;  %v463_v4 = vsub.f32 0.0, %v405_v1  ;;  %v400_v5 = vadd.f32 %v1520_v48, %v399_v2 }
 0x140   : > { %v957_v6 = vpop.f32.mrf.mxu0 }
 0x141   : > { %1103 = vpow2.f32 %v478_v3  ;;  %v484_v7 = vmul.f32 1.442695, %v463_v4  ;;  %v462_v8 = vsub.f32 0.0, %v400_v5  ;;  %v415_v9 = vadd.f32 %v957_v6, %v1520_v48 }
 0x142   : > { %v409_v10 = vpop.f32.mrf.mxu0 }
 0x143   : > { %1105 = vpow2.f32 %v484_v7  ;;  %v482_v11 = vmul.f32 1.442695, %v462_v8  ;;  %v465_v12 = vsub.f32 0.0, %v415_v9  ;;  %v410_v13 = vadd.f32 %v1520_v48, %v409_v10 }
 0x144   : > { %v960_v14 = vpop.f32.mrf.mxu0 }
 0x145   : > { %1107 = vpow2.f32 %v482_v11  ;;  %v488_v15 = vmul.f32 1.442695, %v465_v12  ;;  %v464_v16 = vsub.f32 0.0, %v410_v13  ;;  %v425_v17 = vadd.f32 %v960_v14, %v1520_v48 }
 0x146   : > { %v419_v18 = vpop.f32.mrf.mxu0 }
 0x147   : > { %1109 = vpow2.f32 %v488_v15  ;;  %v486_v19 = vmul.f32 1.442695, %v464_v16  ;;  %v467_v20 = vsub.f32 0.0, %v425_v17  ;;  %v420_v21 = vadd.f32 %v1520_v48, %v419_v18 }
 0x148   : > { %v1098_v22 = vpop.eup %1097  ;;  %v963_v23 = vpop.f32.mrf.mxu0 }
 0x149   : > { %v507_v24 = vadd.f32 1.0, %v1098_v22  ;;  %1111 = vpow2.f32 %v486_v19  ;;  %v492_v25 = vmul.f32 1.442695, %v467_v20  ;;  %v466_v26 = vsub.f32 0.0, %v420_v21 }
 0x14a   : > { %v1100_v27 = vpop.eup %1099  ;;  %v435_v28 = vadd.f32 %v963_v23, %v1520_v48  ;;  %v429_v29 = vpop.f32.mrf.mxu0 }
 0x14b   : > { %1113 = vrcp.f32 %v507_v24  ;;  %v490_v30 = vmul.f32 1.442695, %v466_v26  ;;  %v430_v31 = vadd.f32 %v1520_v48, %v429_v29  ;;  %v506_v32 = vadd.f32 1.0, %v1100_v27 }
 0x14c   : > { %v1102_v33 = vpop.eup %1101  ;;  %1115 = vpow2.f32 %v492_v25  ;;  %v469_v34 = vsub.f32 0.0, %v435_v28  ;;  %v966_v35 = vpop.f32.mrf.mxu0 }
 0x14d   : > { %v509_v36 = vadd.f32 1.0, %v1102_v33  ;;  %1117 = vpow2.f32 %v490_v30  ;;  %v468_v37 = vsub.f32 0.0, %v430_v31  ;;  %v445_v38 = vadd.f32 %v966_v35, %v1520_v48  ;;  %v842_v33 = vld [vmem:[%s1615_s4] ss:$0 sm:$0xff] }
 0x14e   : > { %v1104_v39 = vpop.eup %1103  ;;  %v496_v40 = vmul.f32 1.442695, %v469_v34  ;;  %v439_v41 = vpop.f32.mrf.mxu0  ;;  %1119 = vrcp.f32 %v506_v32 }
 0x14f   : > { %1121 = vrcp.f32 %v509_v36  ;;  %v508_v42 = vadd.f32 1.0, %v1104_v39  ;;  %v494_v43 = vmul.f32 1.442695, %v468_v37  ;;  %v471_v44 = vsub.f32 0.0, %v445_v38 }
 0x150   : > { %v1106_v45 = vpop.eup %1105  ;;  %1123 = vpow2.f32 %v496_v40  ;;  %v440_v46 = vadd.f32 %v1520_v48, %v439_v41  ;;  %v969_v47 = vpop.f32.mrf.mxu0 }
 0x151   : > { %1125 = vrcp.f32 %v508_v42  ;;  %v500_v49 = vmul.f32 1.442695, %v471_v44  ;;  %v455_v50 = vadd.f32 %v969_v47, %v1520_v48  ;;  %v511_v54 = vadd.f32 1.0, %v1106_v45 }
 0x152   : > { %v1108_v51 = vpop.eup %1107  ;;  %1127 = vpow2.f32 %v494_v43  ;;  %v470_v52 = vsub.f32 0.0, %v440_v46  ;;  %v449_v53 = vpop.f32.mrf.mxu0 }
 0x153   : > { %v510_v55 = vadd.f32 1.0, %v1108_v51  ;;  %v473_v56 = vsub.f32 0.0, %v455_v50  ;;  %v450_v57 = vadd.f32 %v1520_v48, %v449_v53  ;;  %1129 = vpow2.f32 %v500_v49 }
 0x154   : > { %v1110_v58 = vpop.eup %1109  ;;  %v498_v59 = vmul.f32 1.442695, %v470_v52 }
 0x155   : > { %1131 = vrcp.f32 %v510_v55  ;;  %v504_v60 = vmul.f32 1.442695, %v473_v56  ;;  %v472_v61 = vsub.f32 0.0, %v450_v57  ;;  %v513_v63 = vadd.f32 1.0, %v1110_v58 }
 0x156   : > { %v1112_v62 = vpop.eup %1111  ;;  %1133 = vpow2.f32 %v498_v59 }
 0x157   : > { %1135 = vrcp.f32 %v511_v54  ;;  %v512_v0 = vadd.f32 1.0, %v1112_v62  ;;  %v502_v1 = vmul.f32 1.442695, %v472_v61 }
 0x158   : > { %v1114_v2 = vpop.eup %1113  ;;  %1137 = vpow2.f32 %v504_v60 }
 0x159   : > { %v1116_v3 = vpop.eup %1115  ;;  %1139 = vrcp.f32 %v512_v0 }
 0x15a   : > { %v1118_v4 = vpop.eup %1117  ;;  %1141 = vpow2.f32 %v502_v1  ;;  %v515_v48 = vadd.f32 1.0, %v1116_v3 }
 0x15b   : > { %v1120_v5 = vpop.eup %1119  ;;  %1143 = vrcp.f32 %v513_v63  ;;  %v514_v6 = vadd.f32 1.0, %v1118_v4 }
 0x15c   : > { %v1122_v7 = vpop.eup %1121  ;;  %1002 = vmatprep.mubr.f32.mxu1 %v1120_v5 }
 0x15d   : > { %v1124_v8 = vpop.eup %1123  ;;  %1145 = vrcp.f32 %v514_v6  ;;  %1003 = vmatmul.mubr.f32.vlgmr.msra.gmra.mxu1 %v1114_v2 }
 0x15e   : > { %v1126_v9 = vpop.eup %1125  ;;  %1147 = vrcp.f32 %v515_v48  ;;  %v517_v11 = vadd.f32 1.0, %v1124_v8 }
 0x15f   : > { %v1128_v10 = vpop.eup %1127  ;;  %1005 = vmatprep.mubr.f32.mxu1 %v1126_v9 }
 0x160   : > { %v516_v12 = vadd.f32 1.0, %v1128_v10  ;;  %v1130_v13 = vpop.eup %1129 }
 0x161   : > { %1006 = vmatmul.mubr.f32.gmra.mxu1 %v1122_v7  ;;  %v519_v16 = vadd.f32 1.0, %v1130_v13 }
 0x162   : > { %v1132_v14 = vpop.eup %1131  ;;  %1149 = vrcp.f32 %v516_v12 }
 0x163   : > { %v1134_v15 = vpop.eup %1133  ;;  %1151 = vrcp.f32 %v517_v11  ;;  %1008 = vmatprep.mubr.f32.mxu1 %v1132_v14 }
 0x164   : > { %v1136_v17 = vpop.eup %1135  ;;  %v518_v18 = vadd.f32 1.0, %v1134_v15 }
 0x165   : > { %v1138_v19 = vpop.eup %1137  ;;  %1009 = vmatmul.mubr.f32.gmra.mxu1 %v1136_v17 }
 0x166   : > { %v1140_v20 = vpop.eup %1139  ;;  %1153 = vrcp.f32 %v518_v18  ;;  %v521_v22 = vadd.f32 1.0, %v1138_v19 }
 0x167   : > { %v1142_v21 = vpop.eup %1141  ;;  %1155 = vrcp.f32 %v519_v16  ;;  %1011 = vmatprep.mubr.f32.mxu1 %v1140_v20 }
 0x168   : > { %v1144_v23 = vpop.eup %1143  ;;  %v520_v24 = vadd.f32 1.0, %v1142_v21 }
 0x169   : > { %1012 = vmatmul.mubr.f32.gmra.mxu1 %v1144_v23 }
 0x16a   : > { %v1146_v25 = vpop.eup %1145  ;;  %1157 = vrcp.f32 %v520_v24 }
 0x16b   : > { %1159 = vrcp.f32 %v521_v22  ;;  %1014 = vmatprep.mubr.f32.mxu1 %v1146_v25  ;;  %v1148_v26 = vpop.eup %1147 }
 0x16d   : > { %1015 = vmatmul.mubr.f32.gmra.mxu1 %v1148_v26 }
 0x16f   : > { %v1150_v27 = vpop.eup %1149 }
 0x170   : > { %v1152_v28 = vpop.eup %1151  ;;  %1017 = vmatprep.mubr.f32.mxu1 %v1150_v27 }
 0x171   : > { %1018 = vmatmul.mubr.f32.gmra.mxu1 %v1152_v28 }
 0x173   : > { %v1154_v29 = vpop.eup %1153 }
 0x174   : > { %v1156_v30 = vpop.eup %1155  ;;  %1020 = vmatprep.mubr.f32.mxu1 %v1154_v29 }
 0x175   : > { %1021 = vmatmul.mubr.f32.gmra.mxu1 %v1156_v30 }
 0x177   : > { %v1158_v31 = vpop.eup %1157 }
 0x178   : > { %v1160_v32 = vpop.eup %1159  ;;  %1023 = vmatprep.mubr.f32.mxu1 %v1158_v31 }
 0x179   : > { %1024 = vmatmul.mubr.f32.gmra.mxu1 %v1160_v32 }
 0x21d   : > { %v1004_v34 = vpop.f32.mrf.mxu1 }
 0x21e   : > { %v633_v35 = vadd.f32 %v1004_v34, %v842_v33 }
 0x21f   : > { %v627_v36 = vpop.f32.mrf.mxu1 }
 0x220   : > { %707 = vst [vmem:[%s1543_s12 + $0x8] sm:$0xff] %v633_v35  ;;  %v628_v37 = vadd.f32 %v842_v33, %v627_v36 }
 0x221   : > { %v1007_v38 = vpop.f32.mrf.mxu1 }
 0x222   : > { %706 = vst [vmem:[%s1543_s12] sm:$0xff] %v628_v37  ;;  %v643_v39 = vadd.f32 %v1007_v38, %v842_v33 }
 0x223   : > { %v637_v40 = vpop.f32.mrf.mxu1 }
 0x224   : > { %709 = vst [vmem:[%s1543_s12 + $0x18] sm:$0xff] %v643_v39  ;;  %v638_v41 = vadd.f32 %v842_v33, %v637_v40 }
 0x225   : > { %v1010_v42 = vpop.f32.mrf.mxu1 }
 0x226   : > { %708 = vst [vmem:[%s1543_s12 + $0x10] sm:$0xff] %v638_v41  ;;  %v653_v43 = vadd.f32 %v1010_v42, %v842_v33 }
 0x227   : > { %v647_v44 = vpop.f32.mrf.mxu1 }
 0x228   : > { %711 = vst [vmem:[%s1543_s12 + $0x28] sm:$0xff] %v653_v43  ;;  %v648_v45 = vadd.f32 %v842_v33, %v647_v44 }
 0x229   : > { %v1013_v46 = vpop.f32.mrf.mxu1 }
 0x22a   : > { %710 = vst [vmem:[%s1543_s12 + $0x20] sm:$0xff] %v648_v45  ;;  %v663_v47 = vadd.f32 %v1013_v46, %v842_v33 }
 0x22b   : > { %v657_v49 = vpop.f32.mrf.mxu1 }
 0x22c   : > { %713 = vst [vmem:[%s1543_s12 + $0x38] sm:$0xff] %v663_v47  ;;  %v658_v50 = vadd.f32 %v842_v33, %v657_v49 }
 0x22d   : > { %v1016_v51 = vpop.f32.mrf.mxu1 }
 0x22e   : > { %712 = vst [vmem:[%s1543_s12 + $0x30] sm:$0xff] %v658_v50  ;;  %v673_v52 = vadd.f32 %v1016_v51, %v842_v33 }
 0x22f   : > { %v667_v53 = vpop.f32.mrf.mxu1 }
 0x230   : > { %715 = vst [vmem:[%s1543_s12 + $0x48] sm:$0xff] %v673_v52  ;;  %v668_v54 = vadd.f32 %v842_v33, %v667_v53 }
 0x231   : > { %v1019_v55 = vpop.f32.mrf.mxu1 }
 0x232   : > { %714 = vst [vmem:[%s1543_s12 + $0x40] sm:$0xff] %v668_v54  ;;  %v683_v56 = vadd.f32 %v1019_v55, %v842_v33 }
 0x233   : > { %v677_v57 = vpop.f32.mrf.mxu1 }
 0x234   : > { %717 = vst [vmem:[%s1543_s12 + $0x58] sm:$0xff] %v683_v56  ;;  %v678_v58 = vadd.f32 %v842_v33, %v677_v57 }
 0x235   : > { %v1022_v59 = vpop.f32.mrf.mxu1 }
 0x236   : > { %716 = vst [vmem:[%s1543_s12 + $0x50] sm:$0xff] %v678_v58  ;;  %v693_v60 = vadd.f32 %v1022_v59, %v842_v33 }
 0x237   : > { %v687_v61 = vpop.f32.mrf.mxu1 }
 0x238   : > { %719 = vst [vmem:[%s1543_s12 + $0x68] sm:$0xff] %v693_v60  ;;  %v688_v62 = vadd.f32 %v842_v33, %v687_v61 }
 0x239   : > { %v1025_v63 = vpop.f32.mrf.mxu1 }
 0x23a   : > { %718 = vst [vmem:[%s1543_s12 + $0x60] sm:$0xff] %v688_v62  ;;  %v703_v0 = vadd.f32 %v1025_v63, %v842_v33 }
 0x23b   : > { %v697_v1 = vpop.f32.mrf.mxu1 }
 0x23c   : > { %721 = vst [vmem:[%s1543_s12 + $0x78] sm:$0xff] %v703_v0  ;;  %v698_v2 = vadd.f32 %v842_v33, %v697_v1 }
 0x23e   : > { %720 = vst [vmem:[%s1543_s12 + $0x70] sm:$0xff] %v698_v2 }
 0x23f   : > { %1254 = shalt.err (!%p1251_p3)
}
 0x240   : > { %s1255_s13 = scalar_lea.hbm %s1564_s11, 2048  ;;  %s1259_s9 = scalar_lea.hbm %s1616_s5, 4096 }
 0x241   : > { %p1256_p11 = scmp.ne.s32.totalorder %s1564_s11, %s1255_s13  ;;  %p1260_p4 = scmp.lt.s32.totalorder %s1564_s11, %s1616_s5 }
 0x242   : > { %p1261_p6 = scmp.lt.s32.totalorder %s1259_s9, %s1255_s13 }
 0x243   : > { %p1257_p9 = pnand %p1256_p11, %p1633_p2 }
 0x244   : > { %p1262_p8 = por %p1261_p6, %p1260_p4 }
 0x245   : > { %p1258_p1 = pneg %p1257_p9 }
 0x247   : > { %p1263_p5 = pnand %p1262_p8, %p1258_p1 }
 0x249   : > { %1266 = shalt.err (!%p1263_p5)
}
 0x24a   : > { %s1317_s14 = smov 128   ;;  %s1318_s7 = smov 8  }
 0x24b   : > { %1036 = dma.vmem_to_hbm [thread:$0]  (%p1633_p2), %s1566_s6, 2048, %s1564_s11, %s723_s17, %s1317_s14, %s1317_s14, %s1318_s7  }
 0x24c PF: > { %s751_s28 = sand.u32 1, %s1297_s18   ;;  %p1634_p7 = scmp.ne.s32.totalorder %s1623_s25, 0 }
 0x24d   : > { %p1635_p12 = scmp.ge.s32.totalorder %s1309_s21, 2  ;;  %s752_s22 = scalar_lea.sflag [#allocation4], %s751_s28 }
 0x24f   : > { %p1050_p13 = pnand %p1635_p12, %p1634_p7 }
 0x251   : > { %p1051_p0 = pneg %p1050_p13 }
 0x253   : > { %1292 = dma.done.wait (%p1051_p0), %s752_s22, 2048  }
 0x254   : > { %1294 = vsyncadd (%p1051_p0), %s752_s22, 4294965248  ;;  %p19_p10 = scmp.ge.s32.totalorder %s1427_s15, 4   ;;  %s1636_s18 = smov %s1301_s19 }
 0x255   : > { %s1637_s19 = smov %s1305_s20  ;;  %s1638_s20 = smov %s1443_s27 }
 0x256   : > { %s1639_s21 = smov %s1427_s15  ;;  %21 = sbr.rel (!%p19_p10) target bundleno = 6 (0x6), region = 93 }
 0x25b   :  { %757 = vsyncpa [#allocation3], 1 }
 0x25c   :  { %759 = vsyncpa [#allocation3 + $0x1], 1 }
 0x25d   :  { %760 = vsyncpa [#allocation6], 1 }
 0x25e   :  { %761 = vsyncpa [#allocation4], 1 }
 0x25f   :  { %763 = vsyncpa [#allocation4 + $0x1], 1 }

</bundles_post_ra>
